<compile_context>
chip_gen: v7x
topology: tpu7x:2x2x1
jax: 0.10.0
libtpu: 0.0.40
codegen_flags: <defaults>
</compile_context>

<pallas_src>
import functools
import math

import jax
import jax.numpy as jnp
from jax import lax
from jax.experimental import pallas as pl
from jax.experimental.pallas import tpu as pltpu

_VMEM_LIMIT = 32 * 1024 * 1024  # explicit scoped-VMEM budget (safe on v5e/v6e/v7x)


def _round_up(x, m):
    return ((x + m - 1) // m) * m


# ---------------------------------------------------------------------------
# Tiled matmul kernel (used for the DFT / inverse-DFT of STFT / ISTFT)
# ---------------------------------------------------------------------------

def _matmul_kernel(a_ref, b_ref, o_ref, acc_ref):
    @pl.when(pl.program_id(2) == 0)
    def _():
        acc_ref[...] = jnp.zeros_like(acc_ref)

    acc_ref[...] += jnp.dot(a_ref[...], b_ref[...], preferred_element_type=jnp.float32)

    @pl.when(pl.program_id(2) == pl.num_programs(2) - 1)
    def _():
        o_ref[...] = acc_ref[...].astype(o_ref.dtype)


def pallas_matmul(a, b, tm_max=128, tn_max=256, tk_max=256):
    """f32 matmul, padded to (8,128)-aligned tiles, K-reduction grid axis last."""
    M, K = a.shape
    K2, N = b.shape
    assert K == K2
    Mp = _round_up(M, 8)
    tm = min(tm_max, Mp)
    Mp = _round_up(Mp, tm)
    Np = _round_up(N, 128)
    tn = min(tn_max, Np)
    Np = _round_up(Np, tn)
    Kp = _round_up(K, 128)
    tk = min(tk_max, Kp)
    Kp = _round_up(Kp, tk)

    a_p = jnp.pad(a.astype(jnp.float32), ((0, Mp - M), (0, Kp - K)))
    b_p = jnp.pad(b.astype(jnp.float32), ((0, Kp - K), (0, Np - N)))

    out = pl.pallas_call(
        _matmul_kernel,
        out_shape=jax.ShapeDtypeStruct((Mp, Np), jnp.float32),
        grid=(Mp // tm, Np // tn, Kp // tk),
        in_specs=[
            pl.BlockSpec((tm, tk), lambda i, j, k: (i, k)),
            pl.BlockSpec((tk, tn), lambda i, j, k: (k, j)),
        ],
        out_specs=pl.BlockSpec((tm, tn), lambda i, j, k: (i, j)),
        scratch_shapes=[pltpu.VMEM((tm, tn), jnp.float32)],
        compiler_params=pltpu.CompilerParams(
            dimension_semantics=("parallel", "parallel", "arbitrary"),
            vmem_limit_bytes=_VMEM_LIMIT,
        ),
    )(a_p, b_p)
    return out[:M, :N]


# ---------------------------------------------------------------------------
# Fused Conv2d (+ optional GLU) kernel — lane-dense, in-kernel tap accumulation
# ---------------------------------------------------------------------------

def _conv_glu_kernel(x_ref, w_ref, b_ref, o_ref, *, taps, out_len, glu):
    # x_ref: (1, Cin, Pext) bf16   (flattened padded spatial + margin, lanes = spatial)
    # w_ref: (n_taps, Ct, Cin) bf16
    # b_ref: (Ct, 1) f32
    # o_ref: (1, Cout, out_len) f32   (spatial on the lane axis -> dense vst)
    ct = b_ref.shape[0]
    # bias folded into the accumulator init (broadcast hoisted out of the tap loop)
    acc = jnp.broadcast_to(b_ref[...], (ct, out_len)).astype(jnp.float32)
    for i, off in enumerate(taps):      # static unrolled tap loop (KH*KW taps)
        acc = acc + jnp.dot(w_ref[i], x_ref[0, :, off:off + out_len],
                            preferred_element_type=jnp.float32)
    if glu:
        c = ct // 2                     # value/gate split along the sublane axis
        acc = acc[:c] * jax.nn.sigmoid(acc[c:])
    o_ref[0] = acc


def conv2d_glu(x_nchw, params, glu):
    """'Same'-padded Conv2d (+ optional GLU gating), NCHW in/out.

    The conv is computed in padded-flat spatial coordinates: for tap (ky, kx) the
    required input is the same flat array shifted by a *constant* offset, so the
    kernel accumulates KH*KW tap matmuls from one margin-padded copy of x instead
    of a materialized im2col tensor.
    """
    w, b, (KH, KW) = params['w'], params['b'], params['ksize']
    B, Cin, H, W = x_nchw.shape
    ph, pw = KH // 2, KW // 2           # assumes odd kernels (3x3 / 7x7 configs)
    Hp, Wp = H + 2 * ph, W + 2 * pw
    P = Hp * Wp
    margin = ph * Wp + pw
    Pext = P + 2 * margin

    xp = jnp.pad(x_nchw, ((0, 0), (0, 0), (ph, ph), (pw, pw)))
    xe = jnp.pad(xp.reshape(B, Cin, P), ((0, 0), (0, 0), (margin, margin)))
    xe = xe.astype(jnp.bfloat16)        # bf16 MXU inputs, f32 accumulation

    taps = tuple(ky * Wp + kx for ky in range(KH) for kx in range(KW))
    ct = w.shape[1]
    cout = ct // 2 if glu else ct

    # TODO(synk): at real spectrogram sizes the spatial axis should additionally be
    # halo-tiled (Element-indexed BlockSpec or manual DMA) so each grid step fits a
    # v7x 64 MiB VMEM budget; at these shapes one batch per grid step fits easily.
    out = pl.pallas_call(
        functools.partial(_conv_glu_kernel, taps=taps, out_len=P, glu=glu),
        out_shape=jax.ShapeDtypeStruct((B, cout, P), jnp.float32),
        grid=(B,),
        in_specs=[
            pl.BlockSpec((1, Cin, Pext), lambda bb: (bb, 0, 0)),
            pl.BlockSpec((KH * KW, ct, Cin), lambda bb: (0, 0, 0)),
            pl.BlockSpec((ct, 1), lambda bb: (0, 0)),
        ],
        out_specs=pl.BlockSpec((1, cout, P), lambda bb: (bb, 0, 0)),
        compiler_params=pltpu.CompilerParams(
            dimension_semantics=("parallel",),
            vmem_limit_bytes=_VMEM_LIMIT,
        ),
    )(xe, w, b.reshape(ct, 1))

    out = out.reshape(B, cout, Hp, Wp)[:, :, ph:ph + H, pw:pw + W]
    return out


# ---------------------------------------------------------------------------
# replace_magnitude (lane-dense elementwise kernel, rsqrt on the EUP)
# ---------------------------------------------------------------------------

def _replace_mag_kernel(re_ref, im_ref, mag_ref, ore_ref, oim_ref):
    re = re_ref[...]
    im = im_ref[...]
    m = mag_ref[...]
    nsq = re * re + im * im
    safe = nsq > 0.0
    inv = lax.rsqrt(jnp.where(safe, nsq, 1.0))
    c = jnp.where(safe, re * inv, 1.0)      # cos(atan2(0, 0)) == 1
    s = jnp.where(safe, im * inv, 0.0)      # sin(atan2(0, 0)) == 0
    ore_ref[...] = m * c
    oim_ref[...] = m * s


def replace_magnitude(x, mag):
    # x: (B, 2, F, T), mag: (B, 1, F, T) -> (B, 2, F, T)
    B, _, F, T = x.shape
    n = B * F * T
    shp = (n // 128, 128) if n % 128 == 0 else (B * F, T)   # lane-dense flattening
    re = x[:, 0].reshape(shp)
    im = x[:, 1].reshape(shp)
    m = mag[:, 0].reshape(shp)
    ore, oim = pl.pallas_call(
        _replace_mag_kernel,
        out_shape=(jax.ShapeDtypeStruct(shp, jnp.float32),
                   jax.ShapeDtypeStruct(shp, jnp.float32)),
        compiler_params=pltpu.CompilerParams(vmem_limit_bytes=_VMEM_LIMIT),
    )(re, im, m)
    return jnp.stack([ore.reshape(B, F, T), oim.reshape(B, F, T)], axis=1)


# ---------------------------------------------------------------------------
# STFT / ISTFT (windowed DFTs as Pallas matmuls; framing / OLA as single XLA ops)
# ---------------------------------------------------------------------------

def hann_window(n_fft):
    n = jnp.arange(n_fft, dtype=jnp.float32)
    return 0.5 - 0.5 * jnp.cos(2.0 * jnp.pi * n / n_fft)   # periodic (torch default)


def make_dft_mats(n_fft, window):
    """Forward DFT (n_fft, 2F) with analysis window folded in, and onesided
    inverse real DFT (2F, n_fft) with synthesis window folded in."""
    F = n_fft // 2 + 1
    n = jnp.arange(n_fft, dtype=jnp.float32)[:, None]
    k = jnp.arange(F, dtype=jnp.float32)[None, :]
    ang = 2.0 * jnp.pi * n * k / n_fft
    fwd = jnp.concatenate([jnp.cos(ang), -jnp.sin(ang)], axis=1) * window[:, None]
    c = jnp.ones((F, 1), jnp.float32).at[1:F - 1].set(2.0)   # DC/Nyquist weights
    ang_t = ang.T
    inv = jnp.concatenate([c * jnp.cos(ang_t) / n_fft,
                           -c * jnp.sin(ang_t) / n_fft], axis=0) * window[None, :]
    return fwd, inv


def stft(wave, fwd_win, n_fft, hop):
    # matches torch.stft(center=True, pad_mode='reflect', onesided=True),
    # already permuted to (B, 2, F, T) as in the module forward.
    B, L = wave.shape
    pad = n_fft // 2
    xp = jnp.pad(wave, ((0, 0), (pad, pad)), mode="reflect")
    T = L // hop + 1
    F = n_fft // 2 + 1
    idx = jnp.arange(T)[:, None] * hop + jnp.arange(n_fft)[None, :]
    frames = jnp.take(xp, idx, axis=1)                     # one vectorized gather
    spec = pallas_matmul(frames.reshape(B * T, n_fft), fwd_win)   # re|im fused
    spec = spec.reshape(B, T, 2 * F)
    spec_re = spec[:, :, :F].transpose(0, 2, 1)
    spec_im = spec[:, :, F:].transpose(0, 2, 1)
    return jnp.stack([spec_re, spec_im], axis=1)


def istft(spec, inv_win, win_sq, n_fft, hop, length):
    # spec: (B, 2, F, T) -> waves (B, length); torch.istft semantics
    B, _, F, T = spec.shape
    re = spec[:, 0].transpose(0, 2, 1).reshape(B * T, F)
    im = spec[:, 1].transpose(0, 2, 1).reshape(B * T, F)
    spec_cat = jnp.concatenate([re, im], axis=-1)          # (B*T, 2F)
    frames = pallas_matmul(spec_cat, inv_win).reshape(B, T, n_fft)  # window folded in
    total = (T - 1) * hop + n_fft
    idx = jnp.arange(T)[:, None] * hop + jnp.arange(n_fft)[None, :]
    # TODO(synk): overlap-add is a data-dependent scatter with no clean BlockSpec
    # form; expressed as one vectorized XLA scatter-add instead of T serial updates.
    y = jnp.zeros((B, total), jnp.float32).at[:, idx].add(frames)
    env = jnp.zeros((total,), jnp.float32).at[idx].add(
        jnp.broadcast_to(win_sq, (T, n_fft)))
    pad = n_fft // 2
    y = y[:, pad:pad + length]
    env = env[pad:pad + length]
    env = jnp.where(env > 1e-11, env, 1.0)                 # guard zero envelope edges
    return y / env


# ---------------------------------------------------------------------------
# DeGLI_DNN ("vanilla") parameters and forward
# ---------------------------------------------------------------------------

def init_convglu_params(key, cin, cout_total, ksize, batchnorm):
    KH, KW = ksize
    fan = cin * KH * KW
    # weight layout (KH*KW, Ct, Cin): tap-major, matching the kernel's tap loop,
    # already transposed for the lane-dense (Ct, spatial) matmul orientation.
    w = jax.random.normal(key, (KH * KW, cout_total, cin), dtype=jnp.float32) / math.sqrt(fan)
    b = jnp.full((cout_total,), 0.01, jnp.float32)
    if batchnorm:
        # TODO(synk): BatchNorm2d is folded assuming eval mode with default running
        # stats (mean=0, var=1, gamma=1, beta=0); training-mode batch stats are not
        # reproduced.
        s = 1.0 / math.sqrt(1.0 + 1e-5)
        w = w * s
        b = b * s
    return dict(w=w.astype(jnp.bfloat16), b=b, ksize=ksize)


def init_dnn_params(key, ch_hidden, k1=(3, 3), k2=(3, 3)):
    ks = jax.random.split(key, 5)
    return dict(
        first=init_convglu_params(ks[0], 6, 2 * ch_hidden, k1, True),          # ConvGLU + BN
        glu2a=init_convglu_params(ks[1], ch_hidden, 2 * ch_hidden, k2, True),  # ConvGLU + BN
        glu2b=init_convglu_params(ks[2], ch_hidden, 2 * ch_hidden, k2, False),
        last=init_convglu_params(ks[3], ch_hidden, 2 * ch_hidden, (7, 7), False),  # default kernel
        final=init_convglu_params(ks[4], ch_hidden, 2, k2, False),             # plain Conv2d -> 2 ch
    )


def degli_dnn_forward(x, mag_replaced, consistent, p):
    # NCHW inputs (B, 2, F, T); cat along channels -> 6, run ConvGLU stack.
    h = jnp.concatenate([x, mag_replaced, consistent], axis=1)
    h = conv2d_glu(h, p['first'], glu=True)
    res = h
    h = conv2d_glu(h, p['glu2a'], glu=True)
    h = conv2d_glu(h, p['glu2b'], glu=True)
    h = h + res
    h = conv2d_glu(h, p['last'], glu=True)
    h = conv2d_glu(h, p['final'], glu=False)
    return h                                               # (B, 2, F, T)


def degli_forward(x, mag, dnn_params, fwd_win, inv_win, win_sq, n_fft, hop, max_length,
                  repeat=1, out_all_block=False):
    out_repeats = []
    residual = None
    for _ in range(repeat):
        for p in dnn_params:
            mag_replaced = replace_magnitude(x, mag)
            waves = istft(mag_replaced, inv_win, win_sq, n_fft, hop, max_length)
            consistent = stft(waves, fwd_win, n_fft, hop)
            residual = degli_dnn_forward(x, mag_replaced, consistent, p)
            x = consistent - residual
        if out_all_block:
            out_repeats.append(x)
    out_stack = jnp.stack(out_repeats, axis=1) if out_all_block else x[:, None]
    final_out = replace_magnitude(x, mag)
    return out_stack, final_out, residual


# ---------------------------------------------------------------------------
# main
# ---------------------------------------------------------------------------

if __name__ == "__main__":
    key = jax.random.PRNGKey(0)

    # Small, self-consistent DeGLI config ("vanilla" model_type):
    n_fft = 30
    hop_length = 15
    n_freq = n_fft // 2 + 1                 # 16
    n_frames = 8
    max_length = (n_frames - 1) * hop_length  # 105 -> stft gives n_frames frames
    B = 2
    depth = 2
    ch_hidden = 8                            # model_config: num_channel=8, k_*1=k_*2=3

    kx, km, kp = jax.random.split(key, 3)
    x = jax.random.normal(kx, (B, 2, n_freq, n_frames), dtype=jnp.float32)
    mag = jnp.abs(jax.random.normal(km, (B, 1, n_freq, n_frames), dtype=jnp.float32))

    dnn_keys = jax.random.split(kp, depth)
    dnn_params = [init_dnn_params(k, ch_hidden) for k in dnn_keys]

    window = hann_window(n_fft)
    fwd_win, inv_win = make_dft_mats(n_fft, window)
    win_sq = window * window

    out_repeats, final_out, residual = degli_forward(
        x, mag, dnn_params, fwd_win, inv_win, win_sq, n_fft, hop_length, max_length,
        repeat=1, out_all_block=False)

    jax.block_until_ready((out_repeats, final_out, residual))
    assert out_repeats.shape == (B, 1, 2, n_freq, n_frames)
    assert final_out.shape == (B, 2, n_freq, n_frames)
    assert residual.shape == (B, 2, n_freq, n_frames)
    assert bool(jnp.all(jnp.isfinite(final_out)))
    print("KERNEL_OK")
</pallas_src>

<mosaic_0001>
module attributes {stable_mosaic.version = 11 : i64} {
  func.func @_replace_mag_kernel(%arg0: memref<2x128xf32, #tpu.memory_space<vmem>>, %arg1: memref<2x128xf32, #tpu.memory_space<vmem>>, %arg2: memref<2x128xf32, #tpu.memory_space<vmem>>, %arg3: memref<2x128xf32, #tpu.memory_space<vmem>>, %arg4: memref<2x128xf32, #tpu.memory_space<vmem>>) attributes {dimension_semantics = [], scalar_prefetch = 0 : i64, scratch_operands = 0 : i64, tpu.core_type = #tpu.core_type<tc>} {
    %c0 = arith.constant 0 : index
    %c0_0 = arith.constant 0 : index
    %0 = vector.load %arg0[%c0, %c0_0] : memref<2x128xf32, #tpu.memory_space<vmem>>, vector<2x128xf32>
    %c0_1 = arith.constant 0 : index
    %c0_2 = arith.constant 0 : index
    %1 = vector.load %arg1[%c0_1, %c0_2] : memref<2x128xf32, #tpu.memory_space<vmem>>, vector<2x128xf32>
    %c0_3 = arith.constant 0 : index
    %c0_4 = arith.constant 0 : index
    %2 = vector.load %arg2[%c0_3, %c0_4] : memref<2x128xf32, #tpu.memory_space<vmem>>, vector<2x128xf32>
    %3 = arith.mulf %0, %0 : vector<2x128xf32>
    %4 = arith.mulf %1, %1 : vector<2x128xf32>
    %5 = arith.addf %3, %4 : vector<2x128xf32>
    %cst = arith.constant 0.000000e+00 : f32
    %6 = vector.broadcast %cst : f32 to vector<2x128xf32>
    %7 = arith.cmpf ogt, %5, %6 : vector<2x128xf32>
    %cst_5 = arith.constant 1.000000e+00 : f32
    %8 = vector.broadcast %cst_5 : f32 to vector<2x128xf32>
    %9 = arith.select %7, %5, %8 : vector<2x128xi1>, vector<2x128xf32>
    %10 = math.rsqrt %9 : vector<2x128xf32>
    %11 = arith.mulf %0, %10 : vector<2x128xf32>
    %cst_6 = arith.constant 1.000000e+00 : f32
    %12 = vector.broadcast %cst_6 : f32 to vector<2x128xf32>
    %13 = arith.select %7, %11, %12 : vector<2x128xi1>, vector<2x128xf32>
    %14 = arith.mulf %1, %10 : vector<2x128xf32>
    %cst_7 = arith.constant 0.000000e+00 : f32
    %15 = vector.broadcast %cst_7 : f32 to vector<2x128xf32>
    %16 = arith.select %7, %14, %15 : vector<2x128xi1>, vector<2x128xf32>
    %17 = arith.mulf %2, %13 : vector<2x128xf32>
    %c0_8 = arith.constant 0 : index
    %c0_9 = arith.constant 0 : index
    %18 = vector.load %arg3[%c0_8, %c0_9] : memref<2x128xf32, #tpu.memory_space<vmem>>, vector<2x128xf32>
    tpu.vector_store %arg3[%c0_8, %c0_9], %17 {strides = array<i32>} : memref<2x128xf32, #tpu.memory_space<vmem>>, vector<2x128xf32>,
    %19 = arith.mulf %2, %16 : vector<2x128xf32>
    %c0_10 = arith.constant 0 : index
    %c0_11 = arith.constant 0 : index
    %20 = vector.load %arg4[%c0_10, %c0_11] : memref<2x128xf32, #tpu.memory_space<vmem>>, vector<2x128xf32>
    tpu.vector_store %arg4[%c0_10, %c0_11], %19 {strides = array<i32>} : memref<2x128xf32, #tpu.memory_space<vmem>>, vector<2x128xf32>,
    return
  }
}

</mosaic_0001>

<bundles_post_ra>
// kernel: tpu_custom_call.1
= control target key start
LH: loop header
LB: loop body
LE: loop exit
PB: predicated region body
PF: predicated region fallthrough
CT: control target
= control target key end

     0   :  { %10 = vsyncpa [#allocation3], 0  ;;  %s223_s0 = inlined_call_operand.hbm [shape: f32[2,128], index: 0, kind: input, shape index: {}]   ;;  %s224_s1 = inlined_call_operand.vmem [shape: f32[2,128], index: 1, kind: input, shape index: {}]   ;;  %s225_s2 = inlined_call_operand.vmem [shape: f32[2,128], index: 2, kind: input, shape index: {}]   ;;  %s226_s3 = inlined_call_operand.hbm [shape: f32[2,128], index: 3, kind: output, shape index: {0}]   ;;  %s227_s4 = inlined_call_operand.hbm [shape: f32[2,128], index: 4, kind: output, shape index: {1}]  }
   0x1   :  { %11 = vsyncpa [#allocation4], 0 }
   0x2   :  { %12 = vsyncpa [#allocation7], 0  ;;  %s153_s15 = smov [#allocation2]   ;;  %s81_s19 = scalar_lea.hbm %s223_s0, 32 }
   0x3   :  { %s19_s16 = sshll.u32 %s153_s15, 4  ;;  %p82_p0 = scmp.ne.s32.totalorder %s223_s0, %s81_s19  ;;  %s20_s16 = int_to_ptr.vmem [resolvable:$true] %s19_s16 }
   0x4   :  { %p85_p1 = scmp.lt.u32.totalorder %s81_s19, %s223_s0 }
   0x6   :  { %p87_p2 = pnand %p85_p1, %p82_p0 }
   0x8   :  { %90 = shalt.err (!%p87_p2)
}
   0x9   :  { %s91_s24 = scalar_lea.vmem %s20_s16, 32  ;;  %p96_p4 = scmp.lt.s32.totalorder %s20_s16, %s20_s16 }
   0xa   :  { %p92_p3 = scmp.ne.s32.totalorder %s20_s16, %s91_s24  ;;  %p97_p5 = scmp.lt.s32.totalorder %s91_s24, %s91_s24 }
   0xc   :  { %p98_p6 = por %p97_p5, %p96_p4 }
   0xe   :  { %p99_p7 = pnand %p98_p6, %p92_p3 }
  0x10   :  { %102 = shalt.err (!%p99_p7)
}
  0x11   :  { %22 = dma.hbm_to_vmem [thread:$0]  %s223_s0, 32, %s20_s16, [#allocation3]  }
  0x12   :  { %147 = dma.done.wait [#allocation3], 32  }
  0x13   :  { %148 = vsyncadd [#allocation3], 4294967264  ;;  %v30_v0 = vld [vmem:[#allocation2] sm:$0x3]  ;;  %s154_s0 = smov [#allocation5]   ;;  %s155_s6 = smov [#allocation6]  }
  0x14   :  { %v31_v1 = vld [vmem:[%s224_s1] sm:$0x3]  ;;  %v33_v2 = vmul.f32 %v30_v0, %v30_v0  ;;  %s53_s5 = sshll.u32 %s154_s0, 4  ;;  %s63_s7 = sshll.u32 %s155_s6, 4  ;;  %s54_s5 = int_to_ptr.vmem [resolvable:$true] %s53_s5  ;;  %s64_s7 = int_to_ptr.vmem [resolvable:$true] %s63_s7 }
  0x15   :  { %v34_v3 = vmul.f32 %v31_v1, %v31_v1  ;;  %v32_v7 = vld [vmem:[%s225_s2] sm:$0x3]  ;;  %s103_s1 = scalar_lea.vmem %s54_s5, 32  ;;  %p108_p9 = scmp.lt.s32.totalorder %s54_s5, %s54_s5 }
  0x16   :  { %p104_p8 = scmp.ne.s32.totalorder %s54_s5, %s103_s1  ;;  %p109_p10 = scmp.lt.s32.totalorder %s103_s1, %s103_s1 }
  0x17   :  { %v35_v4 = vadd.f32 %v34_v3, %v33_v2 }
  0x18   :  { %p110_p11 = por %p109_p10, %p108_p9 }
  0x19   :  { %vm36_vm0 = vcmp.gt.f32.partialorder %v35_v4, 0.0 }
  0x1a   :  { %v37_v5 = vsel %vm36_vm0, %v35_v4, 1.0  ;;  %p111_p12 = pnand %p110_p11, %p104_p8 }
  0x1b   :  { %79 = vrsqrt.f32 %v37_v5 }
  0x25   :  { %v80_v6 = vpop.eup %79 }
  0x26   :  { %v39_v8 = vmul.f32 %v80_v6, %v30_v0  ;;  %v41_v9 = vmul.f32 %v80_v6, %v31_v1 }
  0x28   :  { %v40_v10 = vsel %vm36_vm0, %v39_v8, 1.0  ;;  %v42_v11 = vsel %vm36_vm0, %v41_v9, 0.0 }
  0x29   :  { %v43_v12 = vmul.f32 %v40_v10, %v32_v7  ;;  %v45_v13 = vmul.f32 %v42_v11, %v32_v7 }
  0x2b   :  { %44 = vst [vmem:[#allocation5] sm:$0x3] %v43_v12  ;;  %46 = vst [vmem:[#allocation6] sm:$0x3] %v45_v13 }
  0x2c   :  { %114 = shalt.err (!%p111_p12)
}
  0x2d   :  { %s115_s9 = scalar_lea.hbm %s226_s3, 32 }
  0x2e   :  { %p116_p13 = scmp.ne.s32.totalorder %s226_s3, %s115_s9  ;;  %p119_p0 = scmp.lt.u32.totalorder %s115_s9, %s226_s3 }
  0x30   :  { %p121_p1 = pnand %p119_p0, %p116_p13 }
  0x32   :  { %124 = shalt.err (!%p121_p1)
}
  0x33   :  { %56 = dma.vmem_to_hbm [thread:$0]  %s54_s5, 32, %s226_s3, [#allocation4]  }
  0x34   :  { %s125_s16 = scalar_lea.vmem %s64_s7, 32  ;;  %p130_p3 = scmp.lt.s32.totalorder %s64_s7, %s64_s7 }
  0x35   :  { %p126_p2 = scmp.ne.s32.totalorder %s64_s7, %s125_s16  ;;  %p131_p4 = scmp.lt.s32.totalorder %s125_s16, %s125_s16 }
  0x37   :  { %p132_p5 = por %p131_p4, %p130_p3 }
  0x39   :  { %p133_p6 = pnand %p132_p5, %p126_p2 }
  0x3b   :  { %136 = shalt.err (!%p133_p6)
}
  0x3c   :  { %s137_s19 = scalar_lea.hbm %s227_s4, 32 }
  0x3d   :  { %p138_p7 = scmp.ne.s32.totalorder %s227_s4, %s137_s19  ;;  %p141_p8 = scmp.lt.u32.totalorder %s137_s19, %s227_s4 }
  0x3f   :  { %p143_p9 = pnand %p141_p8, %p138_p7 }
  0x41   :  { %146 = shalt.err (!%p143_p9)
}
  0x42   :  { %66 = dma.vmem_to_hbm [thread:$0]  %s64_s7, 32, %s227_s4, [#allocation7]  }
  0x43   :  { %149 = dma.done.wait [#allocation4], 32  }
  0x44   :  { %150 = vsyncadd [#allocation4], 4294967264 }
  0x45   :  { %151 = dma.done.wait [#allocation7], 32  }
  0x46   :  { %152 = vsyncadd [#allocation7], 4294967264 }
  0x47   :  { %73 = vsyncpa [#allocation3], 1 }
  0x48   :  { %74 = vsyncpa [#allocation4], 1 }
  0x49   :  { %75 = vsyncpa [#allocation7], 1 }

</bundles_post_ra>
